<compile_context>
chip_gen: v6e
topology: v6e:2x2x1
jax: 0.10.0
libtpu: 0.0.40
codegen_flags: <defaults>
</compile_context>

<pallas_src>
from functools import partial

import jax
import jax.numpy as jnp
from jax.experimental import pallas as pl
from jax.experimental.pallas import tpu as pltpu

# ---------------- wrapped-module (Conv2d) hyper-parameters ------------------
C_IN = 4
C_OUT = 8
KS = 3        # kernel_size
STRIDE = 2
PAD = 1
DIL = 1

_VMEM_BUDGET_BYTES = 24 * 1024 * 1024   # conservative (v7x scoped default: 32 MiB)


def _round_up(x, m):
    return ((x + m - 1) // m) * m


def new_lengths(lengths):
    """Exact integer form of floor(clamp((L + 2p - d(k-1) - 1)/s + 1, 1.0))."""
    num = lengths.astype(jnp.int32) + 2 * PAD - DIL * (KS - 1) - 1
    # jnp `//` is floor division, so num < 0 (e.g. L == 0) rounds toward -inf,
    # matching the float floor/clamp formula.
    return jnp.maximum(num // STRIDE + 1, 1).astype(jnp.int32)


def _conv_kernel(ph_ref, w_ref, b_ref, y_ref, patches,
                 *, c_in, ks, d_h, k, k_pad, s_pad):
    """One sample: assemble (K_pad, S_pad) patches in VMEM, one MXU matmul."""
    # Zero the K-padding rows (weight columns there are zero, but uninitialized
    # VMEM could hold NaNs and 0*NaN = NaN).
    if k_pad > k:
        patches[k:, :] = jnp.zeros((k_pad - k, s_pad), patches.dtype)

    # In-VMEM im2col: with stride 2 / 3x3 taps, each tap is one of the 4
    # stride-phases shifted by a small static lane offset (0, 1, D_h, D_h+1).
    # Only contiguous slices are needed (no strided loads, no gathers).
    for kt in range(ks):
        for kd in range(ks):
            p, q = kt % 2, kd % 2
            off = (kt // 2) * d_h + (kd // 2)
            tap = kt * ks + kd
            src = (p * 2 + q) * c_in
            patches[tap * c_in:(tap + 1) * c_in, :] = \
                ph_ref[src:src + c_in, off:off + s_pad]

    # Single (C_out, K_pad) @ (K_pad, S_pad) matmul; MXU is <3% utilized but the
    # kernel is HBM-bound, so the pushes are free filler.
    acc = jnp.dot(w_ref[...], patches[...], preferred_element_type=jnp.float32)
    y_ref[...] = (acc + b_ref[...]).astype(y_ref.dtype)


def length_aware_conv2d(x, lengths, weight, bias, *,
                        compute_dtype=jnp.bfloat16, out_dtype=jnp.float32):
    """Equivalent of LengthAwareWrapper(nn.Conv2d(...)).forward((x, lengths)).

    x:       (N, C_in, T, D) float32  (NCHW, same as PyTorch)
    lengths: (N,)            int32
    weight:  (C_out, C_in, KS, KS) float32
    bias:    (C_out,)        float32
    returns: (y, new_lengths) with y (N, C_out, T_out, D_out), new_lengths (N,)
    """
    N, C, T, D = x.shape
    assert C == C_IN and weight.shape == (C_OUT, C_IN, KS, KS)
    assert STRIDE == 2 and DIL == 1          # phase decomposition below assumes this

    T_out = (T + 2 * PAD - DIL * (KS - 1) - 1) // STRIDE + 1
    D_out = (D + 2 * PAD - DIL * (KS - 1) - 1) // STRIDE + 1

    # ---- stride-2 space-to-depth in XLA (cheap relayout, ~1x the bytes of x) --
    # ph[p, q, c, t', d'] == x_pad[c, 2t'+p, 2d'+q]; every output (to, do) then
    # reads ph[kt%2, kd%2, c, to + kt//2, do + kd//2] -- contiguous per phase.
    T_pe = _round_up(T + 2 * PAD, STRIDE)
    D_pe = _round_up(D + 2 * PAD, STRIDE)
    T_h, D_h = T_pe // STRIDE, D_pe // STRIDE            # == T_out + 1, D_out + 1
    assert T_out + 1 <= T_h and D_out + 1 <= D_h
    x_pe = jnp.pad(x.astype(compute_dtype),
                   ((0, 0), (0, 0), (PAD, T_pe - T - PAD), (PAD, D_pe - D - PAD)))
    ph = x_pe.reshape(N, C, T_h, 2, D_h, 2).transpose(0, 3, 5, 1, 2, 4)
    S_ext = T_h * D_h                                    # extended (uncropped) output grid
    S_pad = _round_up(S_ext, 128)                        # lane-dense output width
    halo = _round_up(D_h + 2, 128)                       # covers max tap offset D_h + 1
    S_in = S_pad + halo
    ph = jnp.pad(ph.reshape(N, 4 * C, S_ext), ((0, 0), (0, 0), (0, S_in - S_ext)))

    # ---- weights: (C_out, K), K = KS*KS*C, tap-major / channel-minor ---------
    K = KS * KS * C
    k_mul = 16 if jnp.dtype(compute_dtype) == jnp.dtype(jnp.bfloat16) else 8
    K_pad = _round_up(K, k_mul)
    w_mat = weight.transpose(0, 2, 3, 1).reshape(C_OUT, K)
    w_mat = jnp.pad(w_mat, ((0, 0), (0, K_pad - K))).astype(compute_dtype)
    b_mat = bias.reshape(C_OUT, 1).astype(jnp.float32)

    # Whole-sample tile: everything for one n must fit VMEM.
    in_item = jnp.dtype(compute_dtype).itemsize
    out_item = jnp.dtype(out_dtype).itemsize
    est_vmem = (2 * 4 * C * S_in * in_item            # phases, double-buffered
                + K_pad * S_pad * in_item             # patches scratch
                + 2 * C_OUT * S_pad * out_item)       # output, double-buffered
    if est_vmem > _VMEM_BUDGET_BYTES:
        # TODO(synk): add an S-tile grid axis with a lane halo for very long T.
        raise NotImplementedError("per-sample working set exceeds the VMEM budget")

    kernel = partial(_conv_kernel, c_in=C, ks=KS, d_h=D_h,
                     k=K, k_pad=K_pad, s_pad=S_pad)

    flops = 2 * N * C_OUT * K_pad * S_pad
    bytes_accessed = (ph.size * in_item + w_mat.size * in_item + b_mat.size * 4
                      + N * C_OUT * S_pad * out_item)

    y_flat = pl.pallas_call(
        kernel,
        out_shape=jax.ShapeDtypeStruct((N, C_OUT, S_pad), out_dtype),
        grid_spec=pltpu.PrefetchScalarGridSpec(
            num_scalar_prefetch=0,
            grid=(N,),
            in_specs=[
                # 4 stride-phases of one sample, resident for the whole step
                pl.BlockSpec((None, 4 * C, S_in), lambda n: (n, 0, 0)),
                # weights / bias resident across the grid
                pl.BlockSpec((C_OUT, K_pad), lambda n: (0, 0)),
                pl.BlockSpec((C_OUT, 1), lambda n: (0, 0)),
            ],
            out_specs=pl.BlockSpec((None, C_OUT, S_pad), lambda n: (n, 0, 0)),
            scratch_shapes=[pltpu.VMEM((K_pad, S_pad), compute_dtype)],
        ),
        compiler_params=pltpu.CompilerParams(dimension_semantics=("parallel",)),
        cost_estimate=pl.CostEstimate(flops=flops, transcendentals=0,
                                      bytes_accessed=bytes_accessed),
    )(ph, w_mat, b_mat)

    # Crop the extended/padded grid back to NCHW (T_out, D_out).
    y = y_flat[:, :, :S_ext].reshape(N, C_OUT, T_h, D_h)[:, :, :T_out, :D_out]
    return y, new_lengths(lengths)


if __name__ == "__main__":
    key = jax.random.PRNGKey(0)
    kx, kw, kb = jax.random.split(key, 3)

    N, T, D = 2, 16, 16
    x = jax.random.normal(kx, (N, C_IN, T, D), dtype=jnp.float32)
    lengths = jnp.array([16, 0], dtype=jnp.int32)        # includes the L=0 clamp case

    weight = jax.random.normal(kw, (C_OUT, C_IN, KS, KS), dtype=jnp.float32) * 0.1
    bias = jax.random.normal(kb, (C_OUT,), dtype=jnp.float32) * 0.1

    def conv_ref(xv, wv):
        return jax.lax.conv_general_dilated(
            xv, wv, window_strides=(STRIDE, STRIDE),
            padding=((PAD, PAD), (PAD, PAD)), rhs_dilation=(DIL, DIL),
            dimension_numbers=("NCHW", "OIHW", "NCHW"),
            preferred_element_type=jnp.float32,
        ) + bias.reshape(1, C_OUT, 1, 1)

    lens_ref = jnp.floor(jnp.maximum(
        (lengths.astype(jnp.float32) + 2 * PAD - DIL * (KS - 1) - 1) / STRIDE + 1,
        1.0)).astype(jnp.int32)

    # Default path: bf16 MXU inputs, f32 accumulation.
    y, nl = length_aware_conv2d(x, lengths, weight, bias)
    jax.block_until_ready((y, nl))
    y_ref = conv_ref(x.astype(jnp.bfloat16).astype(jnp.float32),
                     weight.astype(jnp.bfloat16).astype(jnp.float32))
    assert y.shape == y_ref.shape and y.dtype == jnp.float32
    assert jnp.allclose(y, y_ref, atol=5e-3, rtol=5e-3)
    assert jnp.array_equal(nl, lens_ref)

    # f32 path (module-exact numerics).
    y32, nl32 = length_aware_conv2d(x, lengths, weight, bias,
                                    compute_dtype=jnp.float32)
    jax.block_until_ready((y32, nl32))
    y32_ref = conv_ref(x, weight)
    assert jnp.allclose(y32, y32_ref, atol=5e-3, rtol=5e-3)
    assert jnp.array_equal(nl32, lens_ref)

    print("KERNEL_OK")
</pallas_src>

<mosaic_0001>
module attributes {stable_mosaic.version = 11 : i64} {
  func.func @_conv_kernel(%arg0: i32, %arg1: memref<1x16x256xbf16, #tpu.memory_space<vmem>>, %arg2: memref<8x48xbf16, #tpu.memory_space<vmem>>, %arg3: memref<8x1xf32, #tpu.memory_space<vmem>>, %arg4: memref<1x8x128xf32, #tpu.memory_space<vmem>>, %arg5: memref<48x128xbf16, #tpu.memory_space<vmem>>) attributes {dimension_semantics = [#tpu.dimension_semantics<parallel>], iteration_bounds = array<i64: 2>, scalar_prefetch = 0 : i64, scratch_operands = 1 : i64, tpu.core_type = #tpu.core_type<tc>, window_params = [{transform_indices = @transform_0, window_bounds = array<i64: 1, 16, 256>}, {pipeline_mode = #tpu.pipeline_mode<synchronous>, transform_indices = @transform_1, window_bounds = array<i64: 8, 48>}, {pipeline_mode = #tpu.pipeline_mode<synchronous>, transform_indices = @transform_2, window_bounds = array<i64: 8, 1>}, {transform_indices = @transform_3, window_bounds = array<i64: 1, 8, 128>}]} {
    %cst = arith.constant 0.000000e+00 : bf16
    %0 = vector.broadcast %cst : bf16 to vector<12x128xbf16>
    %c36 = arith.constant 36 : index
    %c0 = arith.constant 0 : index
    %1 = vector.load %arg5[%c36, %c0] : memref<48x128xbf16, #tpu.memory_space<vmem>>, vector<12x128xbf16>
    tpu.vector_store %arg5[%c36, %c0], %0 {strides = array<i32>} : memref<48x128xbf16, #tpu.memory_space<vmem>>, vector<12x128xbf16>,
    %c0_0 = arith.constant 0 : index
    %c0_1 = arith.constant 0 : index
    %c0_2 = arith.constant 0 : index
    %2 = vector.load %arg1[%c0_0, %c0_1, %c0_2] : memref<1x16x256xbf16, #tpu.memory_space<vmem>>, vector<1x4x128xbf16>
    %3 = vector.shape_cast %2 : vector<1x4x128xbf16> to vector<4x128xbf16>
    %c0_3 = arith.constant 0 : index
    %c0_4 = arith.constant 0 : index
    %4 = vector.load %arg5[%c0_3, %c0_4] : memref<48x128xbf16, #tpu.memory_space<vmem>>, vector<4x128xbf16>
    tpu.vector_store %arg5[%c0_3, %c0_4], %3 {strides = array<i32>} : memref<48x128xbf16, #tpu.memory_space<vmem>>, vector<4x128xbf16>,
    %c0_5 = arith.constant 0 : index
    %c4 = arith.constant 4 : index
    %c0_6 = arith.constant 0 : index
    %5 = vector.load %arg1[%c0_5, %c4, %c0_6] : memref<1x16x256xbf16, #tpu.memory_space<vmem>>, vector<1x4x128xbf16>
    %6 = vector.shape_cast %5 : vector<1x4x128xbf16> to vector<4x128xbf16>
    %c4_7 = arith.constant 4 : index
    %c0_8 = arith.constant 0 : index
    %7 = vector.load %arg5[%c4_7, %c0_8] : memref<48x128xbf16, #tpu.memory_space<vmem>>, vector<4x128xbf16>
    tpu.vector_store %arg5[%c4_7, %c0_8], %6 {strides = array<i32>} : memref<48x128xbf16, #tpu.memory_space<vmem>>, vector<4x128xbf16>,
    %c0_9 = arith.constant 0 : index
    %c0_10 = arith.constant 0 : index
    %c1 = arith.constant 1 : index
    %8 = vector.load %arg1[%c0_9, %c0_10, %c1] : memref<1x16x256xbf16, #tpu.memory_space<vmem>>, vector<1x4x128xbf16>
    %9 = vector.shape_cast %8 : vector<1x4x128xbf16> to vector<4x128xbf16>
    %c8 = arith.constant 8 : index
    %c0_11 = arith.constant 0 : index
    %10 = vector.load %arg5[%c8, %c0_11] : memref<48x128xbf16, #tpu.memory_space<vmem>>, vector<4x128xbf16>
    tpu.vector_store %arg5[%c8, %c0_11], %9 {strides = array<i32>} : memref<48x128xbf16, #tpu.memory_space<vmem>>, vector<4x128xbf16>,
    %c0_12 = arith.constant 0 : index
    %c8_13 = arith.constant 8 : index
    %c0_14 = arith.constant 0 : index
    %11 = vector.load %arg1[%c0_12, %c8_13, %c0_14] : memref<1x16x256xbf16, #tpu.memory_space<vmem>>, vector<1x4x128xbf16>
    %12 = vector.shape_cast %11 : vector<1x4x128xbf16> to vector<4x128xbf16>
    %c12 = arith.constant 12 : index
    %c0_15 = arith.constant 0 : index
    %13 = vector.load %arg5[%c12, %c0_15] : memref<48x128xbf16, #tpu.memory_space<vmem>>, vector<4x128xbf16>
    tpu.vector_store %arg5[%c12, %c0_15], %12 {strides = array<i32>} : memref<48x128xbf16, #tpu.memory_space<vmem>>, vector<4x128xbf16>,
    %c0_16 = arith.constant 0 : index
    %c12_17 = arith.constant 12 : index
    %c0_18 = arith.constant 0 : index
    %14 = vector.load %arg1[%c0_16, %c12_17, %c0_18] : memref<1x16x256xbf16, #tpu.memory_space<vmem>>, vector<1x4x128xbf16>
    %15 = vector.shape_cast %14 : vector<1x4x128xbf16> to vector<4x128xbf16>
    %c16 = arith.constant 16 : index
    %c0_19 = arith.constant 0 : index
    %16 = vector.load %arg5[%c16, %c0_19] : memref<48x128xbf16, #tpu.memory_space<vmem>>, vector<4x128xbf16>
    tpu.vector_store %arg5[%c16, %c0_19], %15 {strides = array<i32>} : memref<48x128xbf16, #tpu.memory_space<vmem>>, vector<4x128xbf16>,
    %c0_20 = arith.constant 0 : index
    %c8_21 = arith.constant 8 : index
    %c1_22 = arith.constant 1 : index
    %17 = vector.load %arg1[%c0_20, %c8_21, %c1_22] : memref<1x16x256xbf16, #tpu.memory_space<vmem>>, vector<1x4x128xbf16>
    %18 = vector.shape_cast %17 : vector<1x4x128xbf16> to vector<4x128xbf16>
    %c20 = arith.constant 20 : index
    %c0_23 = arith.constant 0 : index
    %19 = vector.load %arg5[%c20, %c0_23] : memref<48x128xbf16, #tpu.memory_space<vmem>>, vector<4x128xbf16>
    tpu.vector_store %arg5[%c20, %c0_23], %18 {strides = array<i32>} : memref<48x128xbf16, #tpu.memory_space<vmem>>, vector<4x128xbf16>,
    %c0_24 = arith.constant 0 : index
    %c0_25 = arith.constant 0 : index
    %c9 = arith.constant 9 : index
    %20 = vector.load %arg1[%c0_24, %c0_25, %c9] : memref<1x16x256xbf16, #tpu.memory_space<vmem>>, vector<1x4x128xbf16>
    %21 = vector.shape_cast %20 : vector<1x4x128xbf16> to vector<4x128xbf16>
    %c24 = arith.constant 24 : index
    %c0_26 = arith.constant 0 : index
    %22 = vector.load %arg5[%c24, %c0_26] : memref<48x128xbf16, #tpu.memory_space<vmem>>, vector<4x128xbf16>
    tpu.vector_store %arg5[%c24, %c0_26], %21 {strides = array<i32>} : memref<48x128xbf16, #tpu.memory_space<vmem>>, vector<4x128xbf16>,
    %c0_27 = arith.constant 0 : index
    %c4_28 = arith.constant 4 : index
    %c9_29 = arith.constant 9 : index
    %23 = vector.load %arg1[%c0_27, %c4_28, %c9_29] : memref<1x16x256xbf16, #tpu.memory_space<vmem>>, vector<1x4x128xbf16>
    %24 = vector.shape_cast %23 : vector<1x4x128xbf16> to vector<4x128xbf16>
    %c28 = arith.constant 28 : index
    %c0_30 = arith.constant 0 : index
    %25 = vector.load %arg5[%c28, %c0_30] : memref<48x128xbf16, #tpu.memory_space<vmem>>, vector<4x128xbf16>
    tpu.vector_store %arg5[%c28, %c0_30], %24 {strides = array<i32>} : memref<48x128xbf16, #tpu.memory_space<vmem>>, vector<4x128xbf16>,
    %c0_31 = arith.constant 0 : index
    %c0_32 = arith.constant 0 : index
    %c10 = arith.constant 10 : index
    %26 = vector.load %arg1[%c0_31, %c0_32, %c10] : memref<1x16x256xbf16, #tpu.memory_space<vmem>>, vector<1x4x128xbf16>
    %27 = vector.shape_cast %26 : vector<1x4x128xbf16> to vector<4x128xbf16>
    %c32 = arith.constant 32 : index
    %c0_33 = arith.constant 0 : index
    %28 = vector.load %arg5[%c32, %c0_33] : memref<48x128xbf16, #tpu.memory_space<vmem>>, vector<4x128xbf16>
    tpu.vector_store %arg5[%c32, %c0_33], %27 {strides = array<i32>} : memref<48x128xbf16, #tpu.memory_space<vmem>>, vector<4x128xbf16>,
    %c0_34 = arith.constant 0 : index
    %c0_35 = arith.constant 0 : index
    %29 = vector.load %arg2[%c0_34, %c0_35] : memref<8x48xbf16, #tpu.memory_space<vmem>>, vector<8x48xbf16>
    %c0_36 = arith.constant 0 : index
    %c0_37 = arith.constant 0 : index
    %30 = vector.load %arg5[%c0_36, %c0_37] : memref<48x128xbf16, #tpu.memory_space<vmem>>, vector<48x128xbf16>
    %cst_38 = arith.constant dense<0.000000e+00> : vector<8x128xf32>
    %31 = tpu.matmul %29, %30, %cst_38 {dimension_numbers = #tpu.dot_dimension_numbers<[1], [0], [0], [1], [0, 0, 1, 1], [], []>} : vector<8x48xbf16>, vector<48x128xbf16>, vector<8x128xf32> -> vector<8x128xf32>
    %c0_39 = arith.constant 0 : index
    %c0_40 = arith.constant 0 : index
    %32 = vector.load %arg3[%c0_39, %c0_40] : memref<8x1xf32, #tpu.memory_space<vmem>>, vector<8x1xf32>
    %33 = vector.broadcast %32 : vector<8x1xf32> to vector<8x128xf32>
    %34 = arith.addf %31, %33 : vector<8x128xf32>
    %c0_41 = arith.constant 0 : index
    %c0_42 = arith.constant 0 : index
    %c0_43 = arith.constant 0 : index
    %35 = vector.load %arg4[%c0_41, %c0_42, %c0_43] : memref<1x8x128xf32, #tpu.memory_space<vmem>>, vector<1x8x128xf32>
    %36 = vector.shape_cast %35 : vector<1x8x128xf32> to vector<8x128xf32>
    %37 = vector.shape_cast %34 : vector<8x128xf32> to vector<1x8x128xf32>
    tpu.vector_store %arg4[%c0_41, %c0_42, %c0_43], %37 {strides = array<i32>} : memref<1x8x128xf32, #tpu.memory_space<vmem>>, vector<1x8x128xf32>,
    return
  }
  func.func @transform_0(%arg0: i32) -> (i32, i32, i32) {
    %c0_i32 = arith.constant 0 : i32
    %c0_i32_0 = arith.constant 0 : i32
    %c0_i32_1 = arith.constant 0 : i32
    return %arg0, %c0_i32, %c0_i32_0 : i32, i32, i32
  }
  func.func @transform_1(%arg0: i32) -> (i32, i32) {
    %c0_i32 = arith.constant 0 : i32
    %c0_i32_0 = arith.constant 0 : i32
    %c0_i32_1 = arith.constant 0 : i32
    return %c0_i32, %c0_i32_0 : i32, i32
  }
  func.func @transform_2(%arg0: i32) -> (i32, i32) {
    %c0_i32 = arith.constant 0 : i32
    %c0_i32_0 = arith.constant 0 : i32
    %c0_i32_1 = arith.constant 0 : i32
    return %c0_i32, %c0_i32_0 : i32, i32
  }
  func.func @transform_3(%arg0: i32) -> (i32, i32, i32) {
    %c0_i32 = arith.constant 0 : i32
    %c0_i32_0 = arith.constant 0 : i32
    %c0_i32_1 = arith.constant 0 : i32
    return %arg0, %c0_i32, %c0_i32_0 : i32, i32, i32
  }
}

</mosaic_0001>

<bundles_post_ra>
// kernel: tpu_custom_call.1
= control target key start
LH: loop header
LB: loop body
LE: loop exit
PB: predicated region body
PF: predicated region fallthrough
CT: control target
= control target key end

     0   :  { %8 = vsyncpa [#allocation4], 0  ;;  %s797_s0 = inlined_call_operand.hbm [shape: bf16[2,16,256], index: 0, kind: input, shape index: {}]   ;;  %s798_s1 = inlined_call_operand.vmem [shape: bf16[8,48], index: 1, kind: input, shape index: {}]   ;;  %s799_s2 = inlined_call_operand.vmem [shape: f32[8,1], index: 2, kind: input, shape index: {}]   ;;  %s800_s3 = inlined_call_operand.hbm [shape: f32[2,8,128], index: 3, kind: output, shape index: {}]  }
   0x1   :  { %10 = vsyncpa [#allocation4 + $0x1], 0 }
   0x2   :  { %11 = vsyncpa [#allocation5], 0 }
   0x3   :  { %13 = vsyncpa [#allocation5 + $0x1], 0  ;;  %s627_s12 = smov 0   ;;  %s629_s13 = smov 0  }
   0x4   :  { %s631_s14 = smov 0   ;;  %s633_s15 = smov 0  }
   0x5 LB: > { %s648_s16 = sadd.s32 4294967295, %s595_s15   ;;  %s411_s17 = sadd.s32 4294967294, %s595_s15   ;;  %s595_s15 = sphi %s633_s15, %s815_s15   ;;  %s591_s14 = sphi %s631_s14, %s814_s14   ;;  %s587_s13 = sphi %s629_s13, %s813_s13   ;;  %s583_s12 = sphi %s627_s12, %s812_s12  }
   0x6   : > { %s652_s18 = sadd.s32 1, %s595_s15   ;;  %s26_s19 = sadd.s32 1, %s591_s14 }
   0x7   : > { %s23_s20 = ssub.s32 %s595_s15, %s652_s18  ;;  %p33_p0 = scmp.ne.s32.totalorder %s591_s14, %s587_s13 }
   0x8   : > { %p24_p1 = scmp.eq.s32.totalorder %s23_s20, 0  ;;  %p34_p2 = scmp.eq.s32.totalorder %s595_s15, 0 }
   0x9   : > { %p39_p3 = scmp.ne.s32.totalorder %s587_s13, %s583_s12  ;;  %p40_p4 = scmp.eq.s32.totalorder %s648_s16, 0 }
   0xa   : > { %s664_s21 = scalar_select %p24_p1, %s591_s14, %s26_s19  }
   0xb   : > { %p666_p5 = por %p34_p2, %p33_p0  ;;  %p670_p6 = por %p40_p4, %p39_p3 }
   0xc   : > { %p105_p7 = scmp.eq.s32.totalorder %s648_s16, 1  ;;  %p111_p8 = scmp.eq.s32.totalorder %s411_s17, 1 }
   0xd   : > { %s804_s23 = scalar_select %p670_p6, 1, 0 }
   0xe   : > { %p456_p10 = scmp.lt.s32.totalorder %s595_s15, 2  ;;  %p677_p11 = por %p105_p7, %p33_p0 }
   0xf   : > { %p681_p12 = por %p111_p8, %p39_p3  ;;  %s137_s26 = sand.u32 1, %s591_s14  }
  0x10   : > { %s805_s24 = scalar_select %p677_p11, 1, 0 }
  0x11   : > { %s806_s25 = scalar_select %p681_p12, 1, 0 }
  0x12   : > { %s429_s27 = sshll.u32 %s595_s15, 8  ;;  %s414_s28 = sshll.u32 %s137_s26, 4 }
  0x13   : > { %s690_s4 = scalar_lea.hbm %s797_s0, %s429_s27  ;;  %s141_s5 = scalar_lea.vmem [#allocation3], %s414_s28 }
  0x14   : > { %s148_s6 = sshll.u32 %s141_s5, 4  ;;  %p694_p13 = pnand %p456_p10, %p666_p5  ;;  %s698_s6 = int_to_ptr.vmem [resolvable:$true] %s148_s6 }
  0x15   : > { %s700_s8 = scalar_lea.sflag [#allocation4], %s137_s26  ;;  %s503_s9 = scalar_lea.hbm %s690_s4, 256 }
  0x16   : > { %p504_p0 = scmp.ne.s32.totalorder %s690_s4, %s503_s9  ;;  %p505_p1 = pneg %p694_p13 }
  0x17   : > { %s508_s17 = scalar_lea.hbm %s797_s0, 512  ;;  %p509_p4 = scmp.lt.s32.totalorder %s690_s4, %s797_s0 }
  0x18   : > { %p506_p2 = pnand %p505_p1, %p504_p0  ;;  %p510_p5 = scmp.lt.s32.totalorder %s508_s17, %s503_s9 }
  0x1a   : > { %p507_p3 = pneg %p506_p2  ;;  %p511_p7 = por %p510_p5, %p509_p4 }
  0x1c   : > { %p512_p8 = pnand %p511_p7, %p507_p3 }
  0x1e   : > { %515 = shalt.err (!%p512_p8)
}
  0x1f   : > { %s516_s22 = scalar_lea.vmem %s698_s6, 256  ;;  %s597_s26 = smov [#allocation3]  }
  0x20   : > { %p517_p10 = scmp.ne.s32.totalorder %s698_s6, %s516_s22  ;;  %s521_s27 = sshll.u32 %s597_s26, 4  ;;  %s522_s27 = int_to_ptr.vmem [resolvable:$false] %s521_s27 }
  0x21   : > { %s523_s28 = scalar_lea.vmem %s522_s27, 512  ;;  %p524_p2 = scmp.lt.s32.totalorder %s698_s6, %s522_s27 }
  0x22   : > { %p519_p9 = pnand %p517_p10, %p505_p1  ;;  %p525_p12 = scmp.lt.s32.totalorder %s523_s28, %s516_s22 }
  0x24   : > { %p520_p0 = pneg %p519_p9  ;;  %p526_p11 = por %p525_p12, %p524_p2 }
  0x26   : > { %p527_p6 = pnand %p526_p11, %p520_p0 }
  0x28   : > { %530 = shalt.err (!%p527_p6)
}
  0x29   : > { %s598_s29 = smov 128   ;;  %s599_s30 = smov 8  }
  0x2a   : > { %451 = dma.hbm_to_vmem [thread:$0]  (!%p694_p13), %s690_s4, 256, %s698_s6, %s700_s8, %s598_s29, %s598_s29, %s599_s30  }
  0x2b   : > { %p417_p9 = scmp.ge.s32.totalorder %s595_s15, 1  ;;  %p156_p1 = scmp.lt.s32.totalorder %s595_s15, 3 }
  0x2d   : > { %p157_p3 = pnand %p417_p9, %p156_p1 }
  0x2e   : > { %s724_s5 = sand.u32 (!%p157_p3), 1, %s587_s13   ;;  %p808_p6 = scmp.ne.s32.totalorder (!%p157_p3), %s804_s23, 0 }
  0x2f   : > { %160 = sbr.rel (%p157_p3) target bundleno = 402 (0x192), region = 32  ;;  %s418_s9 = sshll.u32 (!%p157_p3), %s724_s5, 4 }
  0x30   : > { %s163_s10 = scalar_lea.sflag (!%p157_p3), [#allocation4], %s724_s5  ;;  %s728_s11 = scalar_lea.vmem (!%p157_p3), [#allocation3], %s418_s9 }
  0x34   : > { %574 = dma.done.wait (%p808_p6), %s163_s10, 256  }
  0x35   : > { %576 = vsyncadd (%p808_p6), %s163_s10, 4294967040  ;;  %v600_v0 = vmov 0   ;;  %v601_v1 = vmov 0.0   ;;  %v242_v2 = vld [vmem:[%s728_s11] sm:$0x33]  ;;  %s602_s4 = smov 118  }
  0x36   : > { %190 = vst [vmem:[#allocation2 + $0x10] sm:$0xc] %v600_v0  ;;  %191 = vst [vmem:[#allocation2 + $0x14] sm:$0xf] %v600_v0  ;;  %498 = vset.pattern.permute.xlu1 %v600_v0  ;;  %499 = vset.pattern.permute.xlu0 %v600_v0  ;;  %v225_v3 = vld [vmem:[%s728_s11] sm:$0x33] }
  0x37   : > { %434 = vmatprep.subr.bf16.mxu0 %v601_v1  ;;  %244 = vrot.lane.b32.xlu0 %v242_v2, %s602_s4  ;;  %s603_s23 = smov 119   ;;  %v234_v4 = vld [vmem:[%s728_s11] sm:$0xcc]  ;;  %v216_v5 = vld [vmem:[%s728_s11 + $0x8] sm:$0x33]  ;;  %s604_s6 = smov 127  }
  0x38   : > { %227 = vrot.lane.b32.xlu1 %v225_v3, %s603_s23  ;;  %v218_v6 = vrot.slane %v216_v5, 6  ;;  %v210_v7 = vld [vmem:[%s728_s11 + $0x8] sm:$0xc]  ;;  %v192_v9 = vld [vmem:[%s728_s11] sm:$0x3]  ;;  %vm605_vm0 = vmmov 0  }
  0x39   : > { %v420_v8 = vrot.slane %v210_v7, 10  ;;  %v194_v10 = vld [vmem:[%s728_s11] sm:$0xc]  ;;  %193 = vst [vmem:[#allocation2] sm:$0x3] %v192_v9  ;;  %440 = vmatprep.mubr.msk.bf16.mxu0 %vm605_vm0, %v601_v1  ;;  %v258_v14 = vld [vmem:[%s799_s2] sm:$0xff] }
  0x3a   : > { %195 = vst [vmem:[#allocation2] sm:$0xc] %v194_v10  ;;  %v205_v11 = vld [vmem:[%s728_s11 + $0x8] sm:$0x3]  ;;  %v196_v13 = vld [vmem:[%s728_s11] sm:$0x33] }
  0x3b   : > { %219 = vrot.lane.b32.xlu0 %v218_v6, %s604_s6  ;;  %215 = vst [vmem:[#allocation2 + $0x8] sm:$0x3] %v420_v8  ;;  %v207_v12 = vrot.slane %v205_v11, 6  ;;  %vm247_vm1 = vcmask 965632   ;;  %vm230_vm2 = vcmask 973824   ;;  %vm201_vm3 = vcmask 1039360  }
  0x3c   : > { %236 = vrot.lane.b32.xlu1 %v234_v4, %s603_s23  ;;  %v251_v33 = vld [vmem:[%s798_s1] sm:$0xf]  ;;  %vm282_vm4 = vcmask 392192   ;;  %s419_s20 = sshll.u32 %s724_s5, 3  ;;  %s426_s22 = sshll.u32 %s648_s16, 7 }
  0x3d   : > { %209 = vst [vmem:[#allocation2 + $0x4] sm:$0xc] %v207_v12  ;;  %s188_s26 = scalar_lea.vmem [#allocation6], %s419_s20  ;;  %s754_s30 = scalar_lea.hbm %s800_s3, %s426_s22 }
  0x3e   : > { %s341_s27 = sshll.u32 %s188_s26, 4  ;;  %s328_s9 = scalar_lea.sflag [#allocation5], %s724_s5  ;;  %s756_s27 = int_to_ptr.vmem [resolvable:$true] %s341_s27 }
  0x3f   : > { %198 = vrot.lane.b32.xlu0 %v196_v13, %s604_s6  ;;  %s531_s10 = scalar_lea.vmem %s756_s27, 128  ;;  %p809_p12 = scmp.ne.s32.totalorder %s805_s24, 0 }
  0x40   : > { %261 = vperm.xlu1 %498, %v258_v14   ;;  %p532_p11 = scmp.ne.s32.totalorder %s756_s27, %s531_s10  ;;  %s606_s16 = smov [#allocation6]  }
  0x41   : > { %s535_s11 = sshll.u32 %s606_s16, 4  ;;  %s536_s11 = int_to_ptr.vmem [resolvable:$false] %s535_s11 }
  0x42   : > { %p533_p13 = pnand %p532_p11, %p809_p12  ;;  %s537_s4 = scalar_lea.vmem %s536_s11, 256 }
  0x43   : > { %p538_p5 = scmp.lt.s32.totalorder %s756_s27, %s536_s11  ;;  %p539_p7 = scmp.lt.s32.totalorder %s537_s4, %s531_s10 }
  0x44   : > { %p534_p4 = pneg %p533_p13 }
  0x45   : > { %p540_p8 = por %p539_p7, %p538_p5 }
  0x47   : > { %p541_p10 = pnand %p540_p8, %p534_p4 }
  0xa9   : > { %v245_v15 = vpop.permute.xlu0 %244 }
  0xaa   : > { %v228_v16 = vpop.permute.xlu1 %227  ;;  %v246_v17 = vrot.slane %v245_v15, 4 }
  0xab   : > { %v229_v18 = vrot.slane %v228_v16, 4 }
  0xac   : > { %v248_v19 = vsel %vm247_vm1, %v245_v15, %v246_v17 }
  0xad   : > { %v231_v20 = vsel %vm230_vm2, %v228_v16, %v229_v18  ;;  %250 = vst [vmem:[#allocation2 + $0x10] sm:$0x3] %v248_v19  ;;  %v220_v22 = vpop.permute.xlu0 %219 }
  0xae   : > { %233 = vst [vmem:[#allocation2 + $0xc] sm:$0x3] %v231_v20  ;;  %v237_v21 = vpop.permute.xlu1 %236  ;;  %v221_v24 = vrot.slane %v220_v22, 4 }
  0xaf   : > { %v238_v23 = vrot.slane %v237_v21, 4 }
  0xb0   : > { %v222_v26 = vsel %vm201_vm3, %v220_v22, %v221_v24 }
  0xb1   : > { %v239_v25 = vsel %vm230_vm2, %v237_v21, %v238_v23  ;;  %224 = vst [vmem:[#allocation2 + $0x8] sm:$0xc] %v222_v26  ;;  %v199_v27 = vpop.permute.xlu0 %198 }
  0xb2   : > { %241 = vst [vmem:[#allocation2 + $0xc] sm:$0xc] %v239_v25  ;;  %v200_v28 = vrot.slane %v199_v27, 4 }
  0xb4   : > { %v202_v29 = vsel %vm201_vm3, %v199_v27, %v200_v28  ;;  %v500_v30 = vld [vmem:[#allocation2 + $0x10] sm:$0xff]  }
  0xb5   : > { %204 = vst [vmem:[#allocation2 + $0x4] sm:$0x3] %v202_v29  ;;  %435 = vmatpush3.bf16.msra.mxu0 %v500_v30 }
  0xb6   : > { %436 = vmatprep.subr.bf16.mxu0 %v601_v1 }
  0xb9   : > { %v501_v31 = vld [vmem:[#allocation2 + $0x8] sm:$0xff]  }
  0xba   : > { %437 = vmatpush3.bf16.msra.mxu0 %v501_v31 }
  0xbb   : > { %438 = vmatprep.subr.bf16.mxu0 %v601_v1  ;;  %v262_v34 = vpop.permute.xlu1 %261 }
  0xbc   : > { %v502_v32 = vld [vmem:[#allocation2] sm:$0xff]  }
  0xbe   : > { %439 = vmatpush3.bf16.msra.mxu0 %v502_v32 }
  0xc1   : > { %441 = vmatmul.mubr.msk.bf16.vlgmr.msra.gmra.mxu0 %vm282_vm4, %v251_v33 }
 0x181   : > { %v320_v35 = vpop.f32.mrf.mxu0 }
 0x182   : > { %v321_v36 = vadd.f32 %v320_v35, %v262_v34 }
 0x183   : > { %v442_v37 = vpop.f32.mrf.mxu0 }
 0x184   : > { %326 = vst [vmem:[%s188_s26] sm:$0xff] %v321_v36 }
 0x185   : > { %v323_v38 = vpop.f32.mrf.mxu0 }
 0x186   : > { %544 = shalt.err (!%p541_p10)
}
 0x187   : > { %s545_s23 = scalar_lea.hbm %s754_s30, 128  ;;  %s549_s7 = scalar_lea.hbm %s800_s3, 256 }
 0x188   : > { %p546_p0 = scmp.ne.s32.totalorder %s754_s30, %s545_s23  ;;  %p550_p1 = scmp.lt.s32.totalorder %s754_s30, %s800_s3 }
 0x189   : > { %p551_p3 = scmp.lt.s32.totalorder %s549_s7, %s545_s23 }
 0x18a   : > { %p547_p2 = pnand %p546_p0, %p809_p12 }
 0x18b   : > { %p552_p6 = por %p551_p3, %p550_p1 }
 0x18c   : > { %p548_p9 = pneg %p547_p2 }
 0x18e   : > { %p553_p11 = pnand %p552_p6, %p548_p9 }
 0x190   : > { %556 = shalt.err (!%p553_p11)
}
 0x191   : > { %446 = dma.vmem_to_hbm [thread:$0]  (%p809_p12), %s756_s27, 128, %s754_s30, %s328_s9   ;;  %v443_v39 = vpop.f32.mrf.mxu0 }
 0x192 PF: > { %s353_s19 = sand.u32 1, %s583_s12   ;;  %p810_p13 = scmp.ne.s32.totalorder %s806_s25, 0 }
 0x193   : > { %p811_p4 = scmp.ge.s32.totalorder %s595_s15, 2  ;;  %s354_s20 = scalar_lea.sflag [#allocation5], %s353_s19 }
 0x195   : > { %p453_p5 = pnand %p811_p4, %p810_p13 }
 0x197   : > { %p454_p7 = pneg %p453_p5 }
 0x199   : > { %578 = dma.done.wait (%p454_p7), %s354_s20, 128  }
 0x19a   : > { %580 = vsyncadd (%p454_p7), %s354_s20, 4294967168  ;;  %p16_p8 = scmp.ge.s32.totalorder %s652_s18, 4   ;;  %s812_s12 = smov %s587_s13 }
 0x19b   : > { %s813_s13 = smov %s591_s14  ;;  %s814_s14 = smov %s664_s21 }
 0x19c   : > { %s815_s15 = smov %s652_s18  ;;  %18 = sbr.rel (!%p16_p8) target bundleno = 5 (0x5), region = 77 }
 0x1a1   :  { %359 = vsyncpa [#allocation4], 1 }
 0x1a2   :  { %361 = vsyncpa [#allocation4 + $0x1], 1 }
 0x1a3   :  { %362 = vsyncpa [#allocation5], 1 }
 0x1a4   :  { %364 = vsyncpa [#allocation5 + $0x1], 1 }

</bundles_post_ra>
